<compile_context>
chip_gen: v6e
topology: v6e:2x2x1
jax: 0.10.0
libtpu: 0.0.40
codegen_flags: <defaults>
</compile_context>

<pallas_src>
import functools

import jax
import jax.numpy as jnp
import numpy as np
from jax import lax
from jax.experimental import pallas as pl
from jax.experimental.pallas import tpu as pltpu

NUM_PERSONS = 2
NUM_PARTS = 8        # stand-in for SMPL's 24 LBS parts
NUM_VERTS = 128      # stand-in for SMPL's 6890 vertices (pad to 6912 at real scale)
MARGIN = 1.0         # `m` in the PyTorch code
LANE = 128
PART_CHUNK = 8       # parts per inner-loop iteration (sublane-aligned)

# Registered buffer from __init__ (unused in forward, kept for parity).
COLL_LOSS_WEIGHT = jnp.asarray(0.0, jnp.float32)

_HI = jax.lax.Precision.HIGHEST


def _flip2(x):
    """Swap the two entries of a size-2 leading axis (used on tiny per-part stats only)."""
    return jnp.concatenate([x[1:2], x[0:1]], axis=0)


def collision_ranking_kernel(verts_ref, trans_ref, mask_ref, pid_ref, out_ref,
                             *, num_parts_padded, part_chunk):
    """verts_ref: (2,3,N) f32 VMEM (model space), trans_ref: (2,1,3) f32 VMEM,
    mask_ref: (2,1,N) f32 VMEM, pid_ref: (1,N) i32 VMEM, out_ref: (1,) f32 SMEM."""
    K = num_parts_padded
    C = part_chunk
    n_chunks = K // C
    N = verts_ref.shape[2]
    f32 = jnp.float32

    verts = verts_ref[...]                    # (2, 3, N) model-space vertices (person axis natural)
    mask = mask_ref[...]                      # (2, 1, N) {0,1} collision mask per person
    pid = pid_ref[...]                        # (1, N) i32 part ids (-1 on padded lanes)
    trans = trans_ref[...]                    # (2, 1, 3) global translations

    # ---- per-part one-hot: vertices on lanes, parts on sublanes ---------------------------
    iota_k = lax.broadcasted_iota(jnp.int32, (K, N), 0)
    onehot = (pid == iota_k).astype(f32)      # (K, N)

    # ---- stage 1: per-part [Σx, Σy, Σz, count] on the MXU ---------------------------------
    # collision mask folded into the tiny 4-row RHS (2*4*N mults), not into the K-row onehot.
    ones_row = jnp.ones((2, 1, N), f32)
    maskv = mask * jnp.concatenate([verts, ones_row], axis=1)        # (2, 4, N)

    dpsq_list = []
    for d in range(2):                                               # d = intruder person
        sums = jnp.einsum('cn,kn->ck', maskv[d], onehot,
                          precision=_HI, preferred_element_type=f32)  # (4, K) parts on lanes
        cnt = jnp.maximum(sums[3:4, :], 1.0)
        mean_l = sums[0:3, :] / cnt                                  # (3, K) model-space means
        # scatter each vertex's own part mean back to the lane axis (tiny MXU matmul, contraction K)
        vmean = jnp.dot(mean_l, onehot, precision=_HI, preferred_element_type=f32)  # (3, N)
        diff = verts[d] - vmean                                      # (3, N)
        sq = diff * diff
        dpsq_list.append(sq[0:1, :] + sq[1:2, :] + sq[2:3, :])       # (1, N)
    d_pull_sq = jnp.stack(dpsq_list, axis=0)                         # (2, 1, N) per-vertex squared pull dist
    dpsq_m = d_pull_sq * mask                                        # (2, 1, N) masked (threshold max)
    dpm = jnp.sqrt(d_pull_sq) * mask                                 # (2, 1, N) masked pull dist (2N sqrts)

    # 5-row stats RHS: [Σx, Σy, Σz, count, Σ d_pull] recomputed per chunk on the MXU.
    stats_rhs = jnp.concatenate([maskv, dpm], axis=1)                # (2, 5, N)

    # Receiver-frame shift of the intruder means: for receiver person p the intruder is 1-p and
    #   || (v_p + t_p) - (mean_{1-p} + t_{1-p}) || = || v_p - (mean_{1-p} + t_{1-p} - t_p) ||.
    tdiff_p = _flip2(trans) - trans                                  # (2, 1, 3)

    # ---- stages 2+3: part-chunked loop; live set stays at (2, C, N) ------------------------
    def chunk_body(ci, acc):
        base = ci * C
        iota_c = lax.broadcasted_iota(jnp.int32, (C, N), 0) + base
        oh_c = (pid == iota_c).astype(f32)                           # (C, N)

        # intruder-side per-part stats for this chunk (parts on sublanes)
        st = jnp.stack(
            [jnp.einsum('kn,cn->kc', oh_c, stats_rhs[d],
                        precision=_HI, preferred_element_type=f32) for d in range(2)],
            axis=0)                                                  # (2, C, 5)
        cnt_pull = st[:, :, 3:4]                                     # (2, C, 1)
        mean = st[:, :, 0:3] / jnp.maximum(cnt_pull, 1.0)            # (2, C, 3) model-space means
        pos_num = st[:, :, 4:5]                                      # (2, C, 1)
        # squared threshold: max of masked squared pull distances (only (2,C,N)-sized op on oh_c)
        thr_sq = jnp.max(oh_c[None, :, :] * dpsq_m, axis=-1, keepdims=True)   # (2, C, 1)

        # re-index by receiver person p = 1 - d: only tiny (2,C,·) stats get flipped,
        # the big receiver-vertex arrays below use the natural person axis directly.
        cnt_pull_p = _flip2(cnt_pull)
        pos_num_p = _flip2(pos_num)
        thr_sq_p = _flip2(thr_sq)
        mshift_p = _flip2(mean) + tdiff_p                            # (2, C, 3)

        # receiver squared distances to the shifted intruder means (translation-free verts)
        dx = verts[:, 0:1, :] - mshift_p[:, :, 0:1]                  # (2, C, N)
        dy = verts[:, 1:2, :] - mshift_p[:, :, 1:2]
        dz = verts[:, 2:3, :] - mshift_p[:, :, 2:3]
        d_rec_sq = dx * dx + dy * dy + dz * dz                       # (2, C, N)
        in_thr = (d_rec_sq < thr_sq_p).astype(f32)                   # (2, C, N) squared-distance gating
        d_rec_in = jnp.sqrt(d_rec_sq) * in_thr                       # (2, C, N) sqrt only for summed norms

        # receiver collision mask folded in via the matmul RHS (no push_mask materialized)
        cnt_push = jnp.einsum('dkn,dcn->dkc', in_thr, mask,
                              precision=_HI, preferred_element_type=f32)   # (2, C, 1)
        neg_num = jnp.einsum('dkn,dcn->dkc', d_rec_in, mask,
                             precision=_HI, preferred_element_type=f32)    # (2, C, 1)

        pos_dist = pos_num_p / jnp.maximum(cnt_pull_p, 1.0)
        neg_dist = neg_num / jnp.maximum(cnt_push, 1.0)
        lossk = jnp.maximum(MARGIN + pos_dist - neg_dist, 0.0)       # (2, C, 1)
        # "id in unique()" -> cnt_pull > 0 ; "if len(push)==0: continue" -> cnt_push > 0
        valid = jnp.logical_and(cnt_pull_p > 0.5, cnt_push > 0.5)
        return acc + jnp.sum(jnp.where(valid, lossk, 0.0))

    total = lax.fori_loop(0, n_chunks, chunk_body, jnp.zeros((1, 1), f32), unroll=True)
    out_ref[0] = jnp.sum(total)


@jax.jit
def collision_loss(verts, global_translations, sdf_mask, part_id):
    """verts: (2, N, 3) f32 model-space vertices; global_translations: (2, 3) f32;
    sdf_mask: (2, N) bool ("intruder inside receiver"); part_id: (N,) i32."""
    num_parts = NUM_PARTS
    _, n0, _ = verts.shape
    n = ((n0 + LANE - 1) // LANE) * LANE                               # pad vertices to 128-lane multiple
    k_pad = ((num_parts + PART_CHUNK - 1) // PART_CHUNK) * PART_CHUNK  # pad parts to chunk multiple

    verts_cn = jnp.transpose(verts, (0, 2, 1)).astype(jnp.float32)     # (2, 3, n0), verts on lanes
    mask_f = sdf_mask.astype(jnp.float32)[:, None, :]                  # (2, 1, n0)
    pid = part_id.astype(jnp.int32)[None, :]                           # (1, n0)
    trans = global_translations.astype(jnp.float32)[:, None, :]        # (2, 1, 3)
    if n != n0:
        pad = n - n0
        verts_cn = jnp.pad(verts_cn, ((0, 0), (0, 0), (0, pad)))
        mask_f = jnp.pad(mask_f, ((0, 0), (0, 0), (0, pad)))           # padded verts never collide
        pid = jnp.pad(pid, ((0, 0), (0, pad)), constant_values=-1)     # never matches any part row

    kernel = functools.partial(collision_ranking_kernel,
                               num_parts_padded=k_pad, part_chunk=PART_CHUNK)
    out = pl.pallas_call(
        kernel,
        out_shape=jax.ShapeDtypeStruct((1,), jnp.float32),
        in_specs=[pl.BlockSpec(memory_space=pltpu.MemorySpace.VMEM),   # verts (model space)
                  pl.BlockSpec(memory_space=pltpu.MemorySpace.VMEM),   # translations
                  pl.BlockSpec(memory_space=pltpu.MemorySpace.VMEM),   # collision masks
                  pl.BlockSpec(memory_space=pltpu.MemorySpace.VMEM)],  # part ids
        out_specs=pl.BlockSpec(memory_space=pltpu.MemorySpace.SMEM),
    )(verts_cn, trans, mask_f, pid)
    return out[0]


def reference_loss(verts_w, masks, pid, margin=1.0):
    """Pure-numpy replica of the PyTorch loop (boolean indexing + .unique())."""
    verts_colls = [verts_w[i][masks[i]] for i in range(2)]
    total = 0.0
    for i in range(2):
        rec = 1 - i
        rec_verts = verts_colls[rec]
        int_verts = verts_colls[i]
        int_coll_id = pid[masks[i]]
        for k in np.unique(int_coll_id):
            pull = int_verts[int_coll_id == k]
            mean = pull.mean(0)
            thr = np.max(np.linalg.norm(pull - mean, axis=-1))
            rd = np.linalg.norm(rec_verts - mean, axis=-1)
            push = rec_verts[rd < thr]
            if len(push) == 0:
                continue
            pos = np.linalg.norm(pull - mean, axis=-1).mean()
            neg = np.linalg.norm(push - mean, axis=-1).mean()
            total += max(margin + pos - neg, 0.0)
    return np.float32(total)


if __name__ == "__main__":
    # TODO(synk): the SMPL body-model forward and the SDF mesh-library query have no Pallas
    # equivalent; their outputs (vertices, collision masks, part ids) are synthesized here.
    # (Performance tuning should be done at real SMPL scale: N padded to 6912, K=24.)
    key = jax.random.PRNGKey(0)
    k1, k2, k3 = jax.random.split(key, 3)

    verts = jax.random.normal(k1, (NUM_PERSONS, NUM_VERTS, 3), jnp.float32) * 0.3
    global_translations = jnp.array([[0.0, 0.0, 0.0], [0.25, 0.0, 0.0]], jnp.float32)
    sdf_mask = jax.random.bernoulli(k2, 0.4, (NUM_PERSONS, NUM_VERTS))
    part_id = jax.random.randint(k3, (NUM_VERTS,), 0, NUM_PARTS, dtype=jnp.int32)

    out = collision_loss(verts, global_translations, sdf_mask, part_id)
    out = jax.block_until_ready(out)

    # Cross-check against a direct numpy replica of the torch loop.
    verts_w_np = np.asarray(verts + global_translations[:, None, :])
    ref = reference_loss(verts_w_np, np.asarray(sdf_mask), np.asarray(part_id), MARGIN)
    np.testing.assert_allclose(np.asarray(out), ref, rtol=1e-4, atol=1e-4)

    print("KERNEL_OK")
</pallas_src>

<mosaic_0001>
module attributes {stable_mosaic.version = 11 : i64} {
  func.func @collision_ranking_kernel(%arg0: memref<2x3x128xf32, #tpu.memory_space<vmem>>, %arg1: memref<2x1x3xf32, #tpu.memory_space<vmem>>, %arg2: memref<2x1x128xf32, #tpu.memory_space<vmem>>, %arg3: memref<1x128xi32, #tpu.memory_space<vmem>>, %arg4: memref<1xf32, #tpu.memory_space<smem>>) attributes {dimension_semantics = [], scalar_prefetch = 0 : i64, scratch_operands = 0 : i64, tpu.core_type = #tpu.core_type<tc>} {
    %c0 = arith.constant 0 : index
    %c0_0 = arith.constant 0 : index
    %c0_1 = arith.constant 0 : index
    %0 = vector.load %arg0[%c0, %c0_0, %c0_1] : memref<2x3x128xf32, #tpu.memory_space<vmem>>, vector<2x3x128xf32>
    %c0_2 = arith.constant 0 : index
    %c0_3 = arith.constant 0 : index
    %c0_4 = arith.constant 0 : index
    %1 = vector.load %arg2[%c0_2, %c0_3, %c0_4] : memref<2x1x128xf32, #tpu.memory_space<vmem>>, vector<2x1x128xf32>
    %c0_5 = arith.constant 0 : index
    %c0_6 = arith.constant 0 : index
    %2 = vector.load %arg3[%c0_5, %c0_6] : memref<1x128xi32, #tpu.memory_space<vmem>>, vector<1x128xi32>
    %c0_7 = arith.constant 0 : index
    %c0_8 = arith.constant 0 : index
    %c0_9 = arith.constant 0 : index
    %3 = vector.load %arg1[%c0_7, %c0_8, %c0_9] : memref<2x1x3xf32, #tpu.memory_space<vmem>>, vector<2x1x3xf32>
    %4 = tpu.iota {dimensions = array<i32: 0>} : vector<8x128xi32>
    %5 = vector.broadcast %2 : vector<1x128xi32> to vector<8x128xi32>
    %6 = arith.cmpi eq, %5, %4 : vector<8x128xi32>
    %7 = arith.extui %6 : vector<8x128xi1> to vector<8x128xi32>
    %8 = arith.sitofp %7 : vector<8x128xi32> to vector<8x128xf32>
    %cst = arith.constant 1.000000e+00 : f32
    %9 = vector.broadcast %cst : f32 to vector<2x1x128xf32>
    %10 = tpu.concatenate %0, %9 in 1 : vector<2x3x128xf32>, vector<2x1x128xf32> -> vector<2x4x128xf32>
    %11 = vector.broadcast %1 : vector<2x1x128xf32> to vector<2x4x128xf32>
    %12 = arith.mulf %11, %10 : vector<2x4x128xf32>
    %13 = vector.extract_strided_slice %12 {offsets = [0, 0, 0], sizes = [1, 4, 128], strides = [1, 1, 1]} : vector<2x4x128xf32> to vector<1x4x128xf32>
    %14 = vector.shape_cast %13 : vector<1x4x128xf32> to vector<4x128xf32>
    "tpu.trace_start"() <{level = 10 : i32, message = "cn,kn->ck"}> : () -> ()
    %cst_10 = arith.constant dense<0.000000e+00> : vector<4x8xf32>
    %15 = tpu.matmul %14, %8, %cst_10 {dimension_numbers = #tpu.dot_dimension_numbers<[1], [1], [0], [0], [0, 0, 1, 0], [], []>, precision = #tpu.contract_precision<fp32>} : vector<4x128xf32>, vector<8x128xf32>, vector<4x8xf32> -> vector<4x8xf32>
    "tpu.trace_stop"() : () -> ()
    %16 = vector.extract_strided_slice %15 {offsets = [3, 0], sizes = [1, 8], strides = [1, 1]} : vector<4x8xf32> to vector<1x8xf32>
    %cst_11 = arith.constant 1.000000e+00 : f32
    %17 = vector.broadcast %cst_11 : f32 to vector<1x8xf32>
    %18 = arith.maximumf %16, %17 : vector<1x8xf32>
    %19 = vector.extract_strided_slice %15 {offsets = [0, 0], sizes = [3, 8], strides = [1, 1]} : vector<4x8xf32> to vector<3x8xf32>
    %20 = vector.broadcast %18 : vector<1x8xf32> to vector<3x8xf32>
    %21 = arith.divf %19, %20 : vector<3x8xf32>
    %cst_12 = arith.constant dense<0.000000e+00> : vector<3x128xf32>
    %22 = tpu.matmul %21, %8, %cst_12 {dimension_numbers = #tpu.dot_dimension_numbers<[1], [0], [0], [1], [0, 0, 1, 1], [], []>, precision = #tpu.contract_precision<fp32>} : vector<3x8xf32>, vector<8x128xf32>, vector<3x128xf32> -> vector<3x128xf32>
    %23 = vector.extract_strided_slice %0 {offsets = [0, 0, 0], sizes = [1, 3, 128], strides = [1, 1, 1]} : vector<2x3x128xf32> to vector<1x3x128xf32>
    %24 = vector.shape_cast %23 : vector<1x3x128xf32> to vector<3x128xf32>
    %25 = arith.subf %24, %22 : vector<3x128xf32>
    %26 = arith.mulf %25, %25 : vector<3x128xf32>
    %27 = vector.extract_strided_slice %26 {offsets = [0, 0], sizes = [1, 128], strides = [1, 1]} : vector<3x128xf32> to vector<1x128xf32>
    %28 = vector.extract_strided_slice %26 {offsets = [1, 0], sizes = [1, 128], strides = [1, 1]} : vector<3x128xf32> to vector<1x128xf32>
    %29 = arith.addf %27, %28 : vector<1x128xf32>
    %30 = vector.extract_strided_slice %26 {offsets = [2, 0], sizes = [1, 128], strides = [1, 1]} : vector<3x128xf32> to vector<1x128xf32>
    %31 = arith.addf %29, %30 : vector<1x128xf32>
    %32 = vector.extract_strided_slice %12 {offsets = [1, 0, 0], sizes = [1, 4, 128], strides = [1, 1, 1]} : vector<2x4x128xf32> to vector<1x4x128xf32>
    %33 = vector.shape_cast %32 : vector<1x4x128xf32> to vector<4x128xf32>
    "tpu.trace_start"() <{level = 10 : i32, message = "cn,kn->ck"}> : () -> ()
    %cst_13 = arith.constant dense<0.000000e+00> : vector<4x8xf32>
    %34 = tpu.matmul %33, %8, %cst_13 {dimension_numbers = #tpu.dot_dimension_numbers<[1], [1], [0], [0], [0, 0, 1, 0], [], []>, precision = #tpu.contract_precision<fp32>} : vector<4x128xf32>, vector<8x128xf32>, vector<4x8xf32> -> vector<4x8xf32>
    "tpu.trace_stop"() : () -> ()
    %35 = vector.extract_strided_slice %34 {offsets = [3, 0], sizes = [1, 8], strides = [1, 1]} : vector<4x8xf32> to vector<1x8xf32>
    %cst_14 = arith.constant 1.000000e+00 : f32
    %36 = vector.broadcast %cst_14 : f32 to vector<1x8xf32>
    %37 = arith.maximumf %35, %36 : vector<1x8xf32>
    %38 = vector.extract_strided_slice %34 {offsets = [0, 0], sizes = [3, 8], strides = [1, 1]} : vector<4x8xf32> to vector<3x8xf32>
    %39 = vector.broadcast %37 : vector<1x8xf32> to vector<3x8xf32>
    %40 = arith.divf %38, %39 : vector<3x8xf32>
    %cst_15 = arith.constant dense<0.000000e+00> : vector<3x128xf32>
    %41 = tpu.matmul %40, %8, %cst_15 {dimension_numbers = #tpu.dot_dimension_numbers<[1], [0], [0], [1], [0, 0, 1, 1], [], []>, precision = #tpu.contract_precision<fp32>} : vector<3x8xf32>, vector<8x128xf32>, vector<3x128xf32> -> vector<3x128xf32>
    %42 = vector.extract_strided_slice %0 {offsets = [1, 0, 0], sizes = [1, 3, 128], strides = [1, 1, 1]} : vector<2x3x128xf32> to vector<1x3x128xf32>
    %43 = vector.shape_cast %42 : vector<1x3x128xf32> to vector<3x128xf32>
    %44 = arith.subf %43, %41 : vector<3x128xf32>
    %45 = arith.mulf %44, %44 : vector<3x128xf32>
    %46 = vector.extract_strided_slice %45 {offsets = [0, 0], sizes = [1, 128], strides = [1, 1]} : vector<3x128xf32> to vector<1x128xf32>
    %47 = vector.extract_strided_slice %45 {offsets = [1, 0], sizes = [1, 128], strides = [1, 1]} : vector<3x128xf32> to vector<1x128xf32>
    %48 = arith.addf %46, %47 : vector<1x128xf32>
    %49 = vector.extract_strided_slice %45 {offsets = [2, 0], sizes = [1, 128], strides = [1, 1]} : vector<3x128xf32> to vector<1x128xf32>
    %50 = arith.addf %48, %49 : vector<1x128xf32>
    %51 = vector.shape_cast %31 : vector<1x128xf32> to vector<1x1x128xf32>
    %52 = vector.shape_cast %50 : vector<1x128xf32> to vector<1x1x128xf32>
    %53 = tpu.concatenate %51, %52 in 0 : vector<1x1x128xf32>, vector<1x1x128xf32> -> vector<2x1x128xf32>
    %54 = arith.mulf %53, %1 : vector<2x1x128xf32>
    %55 = math.sqrt %53 : vector<2x1x128xf32>
    %56 = arith.mulf %55, %1 : vector<2x1x128xf32>
    %57 = tpu.concatenate %12, %56 in 1 : vector<2x4x128xf32>, vector<2x1x128xf32> -> vector<2x5x128xf32>
    %58 = vector.extract_strided_slice %3 {offsets = [1, 0, 0], sizes = [1, 1, 3], strides = [1, 1, 1]} : vector<2x1x3xf32> to vector<1x1x3xf32>
    %59 = vector.extract_strided_slice %3 {offsets = [0, 0, 0], sizes = [1, 1, 3], strides = [1, 1, 1]} : vector<2x1x3xf32> to vector<1x1x3xf32>
    %60 = tpu.concatenate %58, %59 in 0 : vector<1x1x3xf32>, vector<1x1x3xf32> -> vector<2x1x3xf32>
    %61 = arith.subf %60, %3 : vector<2x1x3xf32>
    %cst_16 = arith.constant 0.000000e+00 : f32
    %62 = vector.broadcast %cst_16 : f32 to vector<1x1xf32>
    %c0_i32 = arith.constant 0 : i32
    %c8_i32 = arith.constant 8 : i32
    %63 = arith.muli %c0_i32, %c8_i32 : i32
    %64 = tpu.iota {dimensions = array<i32: 0>} : vector<8x128xi32>
    %65 = vector.broadcast %63 : i32 to vector<8x128xi32>
    %66 = arith.addi %64, %65 : vector<8x128xi32>
    %67 = vector.broadcast %2 : vector<1x128xi32> to vector<8x128xi32>
    %68 = arith.cmpi eq, %67, %66 : vector<8x128xi32>
    %69 = arith.extui %68 : vector<8x128xi1> to vector<8x128xi32>
    %70 = arith.sitofp %69 : vector<8x128xi32> to vector<8x128xf32>
    %71 = vector.extract_strided_slice %57 {offsets = [0, 0, 0], sizes = [1, 5, 128], strides = [1, 1, 1]} : vector<2x5x128xf32> to vector<1x5x128xf32>
    %72 = vector.shape_cast %71 : vector<1x5x128xf32> to vector<5x128xf32>
    "tpu.trace_start"() <{level = 10 : i32, message = "kn,cn->kc"}> : () -> ()
    %cst_17 = arith.constant dense<0.000000e+00> : vector<8x5xf32>
    %73 = tpu.matmul %70, %72, %cst_17 {dimension_numbers = #tpu.dot_dimension_numbers<[1], [1], [0], [0], [0, 0, 1, 0], [], []>, precision = #tpu.contract_precision<fp32>} : vector<8x128xf32>, vector<5x128xf32>, vector<8x5xf32> -> vector<8x5xf32>
    "tpu.trace_stop"() : () -> ()
    %74 = vector.extract_strided_slice %57 {offsets = [1, 0, 0], sizes = [1, 5, 128], strides = [1, 1, 1]} : vector<2x5x128xf32> to vector<1x5x128xf32>
    %75 = vector.shape_cast %74 : vector<1x5x128xf32> to vector<5x128xf32>
    "tpu.trace_start"() <{level = 10 : i32, message = "kn,cn->kc"}> : () -> ()
    %cst_18 = arith.constant dense<0.000000e+00> : vector<8x5xf32>
    %76 = tpu.matmul %70, %75, %cst_18 {dimension_numbers = #tpu.dot_dimension_numbers<[1], [1], [0], [0], [0, 0, 1, 0], [], []>, precision = #tpu.contract_precision<fp32>} : vector<8x128xf32>, vector<5x128xf32>, vector<8x5xf32> -> vector<8x5xf32>
    "tpu.trace_stop"() : () -> ()
    %77 = vector.shape_cast %73 : vector<8x5xf32> to vector<1x8x5xf32>
    %78 = vector.shape_cast %76 : vector<8x5xf32> to vector<1x8x5xf32>
    %79 = tpu.concatenate %77, %78 in 0 : vector<1x8x5xf32>, vector<1x8x5xf32> -> vector<2x8x5xf32>
    %80 = vector.extract_strided_slice %79 {offsets = [0, 0, 3], sizes = [2, 8, 1], strides = [1, 1, 1]} : vector<2x8x5xf32> to vector<2x8x1xf32>
    %81 = vector.extract_strided_slice %79 {offsets = [0, 0, 0], sizes = [2, 8, 3], strides = [1, 1, 1]} : vector<2x8x5xf32> to vector<2x8x3xf32>
    %cst_19 = arith.constant 1.000000e+00 : f32
    %82 = vector.broadcast %cst_19 : f32 to vector<2x8x1xf32>
    %83 = arith.maximumf %80, %82 : vector<2x8x1xf32>
    %84 = vector.broadcast %83 : vector<2x8x1xf32> to vector<2x8x3xf32>
    %85 = arith.divf %81, %84 : vector<2x8x3xf32>
    %86 = vector.extract_strided_slice %79 {offsets = [0, 0, 4], sizes = [2, 8, 1], strides = [1, 1, 1]} : vector<2x8x5xf32> to vector<2x8x1xf32>
    %87 = vector.shape_cast %70 : vector<8x128xf32> to vector<1x8x128xf32>
    %88 = vector.broadcast %87 : vector<1x8x128xf32> to vector<2x8x128xf32>
    %89 = vector.broadcast %54 : vector<2x1x128xf32> to vector<2x8x128xf32>
    %90 = arith.mulf %88, %89 : vector<2x8x128xf32>
    %cst_20 = arith.constant dense<0xFF800000> : vector<2x8xf32>
    %91 = vector.multi_reduction <maximumf>, %90, %cst_20 [2] : vector<2x8x128xf32> to vector<2x8xf32>
    %92 = vector.shape_cast %91 : vector<2x8xf32> to vector<2x8x1xf32>
    %93 = vector.extract_strided_slice %80 {offsets = [1, 0, 0], sizes = [1, 8, 1], strides = [1, 1, 1]} : vector<2x8x1xf32> to vector<1x8x1xf32>
    %94 = vector.extract_strided_slice %80 {offsets = [0, 0, 0], sizes = [1, 8, 1], strides = [1, 1, 1]} : vector<2x8x1xf32> to vector<1x8x1xf32>
    %95 = tpu.concatenate %93, %94 in 0 : vector<1x8x1xf32>, vector<1x8x1xf32> -> vector<2x8x1xf32>
    %96 = vector.extract_strided_slice %86 {offsets = [1, 0, 0], sizes = [1, 8, 1], strides = [1, 1, 1]} : vector<2x8x1xf32> to vector<1x8x1xf32>
    %97 = vector.extract_strided_slice %86 {offsets = [0, 0, 0], sizes = [1, 8, 1], strides = [1, 1, 1]} : vector<2x8x1xf32> to vector<1x8x1xf32>
    %98 = tpu.concatenate %96, %97 in 0 : vector<1x8x1xf32>, vector<1x8x1xf32> -> vector<2x8x1xf32>
    %99 = vector.extract_strided_slice %92 {offsets = [1, 0, 0], sizes = [1, 8, 1], strides = [1, 1, 1]} : vector<2x8x1xf32> to vector<1x8x1xf32>
    %100 = vector.extract_strided_slice %92 {offsets = [0, 0, 0], sizes = [1, 8, 1], strides = [1, 1, 1]} : vector<2x8x1xf32> to vector<1x8x1xf32>
    %101 = tpu.concatenate %99, %100 in 0 : vector<1x8x1xf32>, vector<1x8x1xf32> -> vector<2x8x1xf32>
    %102 = vector.extract_strided_slice %85 {offsets = [1, 0, 0], sizes = [1, 8, 3], strides = [1, 1, 1]} : vector<2x8x3xf32> to vector<1x8x3xf32>
    %103 = vector.extract_strided_slice %85 {offsets = [0, 0, 0], sizes = [1, 8, 3], strides = [1, 1, 1]} : vector<2x8x3xf32> to vector<1x8x3xf32>
    %104 = tpu.concatenate %102, %103 in 0 : vector<1x8x3xf32>, vector<1x8x3xf32> -> vector<2x8x3xf32>
    %105 = vector.broadcast %61 : vector<2x1x3xf32> to vector<2x8x3xf32>
    %106 = arith.addf %104, %105 : vector<2x8x3xf32>
    %107 = vector.extract_strided_slice %0 {offsets = [0, 0, 0], sizes = [2, 1, 128], strides = [1, 1, 1]} : vector<2x3x128xf32> to vector<2x1x128xf32>
    %108 = vector.extract_strided_slice %106 {offsets = [0, 0, 0], sizes = [2, 8, 1], strides = [1, 1, 1]} : vector<2x8x3xf32> to vector<2x8x1xf32>
    %109 = vector.broadcast %107 : vector<2x1x128xf32> to vector<2x8x128xf32>
    %110 = vector.broadcast %108 : vector<2x8x1xf32> to vector<2x8x128xf32>
    %111 = arith.subf %109, %110 : vector<2x8x128xf32>
    %112 = vector.extract_strided_slice %0 {offsets = [0, 1, 0], sizes = [2, 1, 128], strides = [1, 1, 1]} : vector<2x3x128xf32> to vector<2x1x128xf32>
    %113 = vector.extract_strided_slice %106 {offsets = [0, 0, 1], sizes = [2, 8, 1], strides = [1, 1, 1]} : vector<2x8x3xf32> to vector<2x8x1xf32>
    %114 = vector.broadcast %112 : vector<2x1x128xf32> to vector<2x8x128xf32>
    %115 = vector.broadcast %113 : vector<2x8x1xf32> to vector<2x8x128xf32>
    %116 = arith.subf %114, %115 : vector<2x8x128xf32>
    %117 = vector.extract_strided_slice %0 {offsets = [0, 2, 0], sizes = [2, 1, 128], strides = [1, 1, 1]} : vector<2x3x128xf32> to vector<2x1x128xf32>
    %118 = vector.extract_strided_slice %106 {offsets = [0, 0, 2], sizes = [2, 8, 1], strides = [1, 1, 1]} : vector<2x8x3xf32> to vector<2x8x1xf32>
    %119 = vector.broadcast %117 : vector<2x1x128xf32> to vector<2x8x128xf32>
    %120 = vector.broadcast %118 : vector<2x8x1xf32> to vector<2x8x128xf32>
    %121 = arith.subf %119, %120 : vector<2x8x128xf32>
    %122 = arith.mulf %111, %111 : vector<2x8x128xf32>
    %123 = arith.mulf %116, %116 : vector<2x8x128xf32>
    %124 = arith.addf %122, %123 : vector<2x8x128xf32>
    %125 = arith.mulf %121, %121 : vector<2x8x128xf32>
    %126 = arith.addf %124, %125 : vector<2x8x128xf32>
    %127 = vector.broadcast %101 : vector<2x8x1xf32> to vector<2x8x128xf32>
    %128 = arith.cmpf olt, %126, %127 : vector<2x8x128xf32>
    %129 = arith.extui %128 : vector<2x8x128xi1> to vector<2x8x128xi32>
    %130 = arith.sitofp %129 : vector<2x8x128xi32> to vector<2x8x128xf32>
    %131 = math.sqrt %126 : vector<2x8x128xf32>
    %132 = arith.mulf %131, %130 : vector<2x8x128xf32>
    "tpu.trace_start"() <{level = 10 : i32, message = "dkn,dcn->dkc"}> : () -> ()
    %cst_21 = arith.constant dense<0.000000e+00> : vector<2x8x1xf32>
    %133 = tpu.matmul %130, %1, %cst_21 {dimension_numbers = #tpu.dot_dimension_numbers<[2], [2], [1], [1], [0, 0, 0, 1, 1, 1], [0], [0]>, precision = #tpu.contract_precision<fp32>} : vector<2x8x128xf32>, vector<2x1x128xf32>, vector<2x8x1xf32> -> vector<2x8x1xf32>
    %cst_22 = arith.constant dense<0.000000e+00> : vector<2x8x1xf32>
    %134 = tpu.matmul %132, %1, %cst_22 {dimension_numbers = #tpu.dot_dimension_numbers<[2], [2], [1], [1], [0, 0, 0, 1, 1, 1], [0], [0]>, precision = #tpu.contract_precision<fp32>} : vector<2x8x128xf32>, vector<2x1x128xf32>, vector<2x8x1xf32> -> vector<2x8x1xf32>
    "tpu.trace_stop"() : () -> ()
    %cst_23 = arith.constant 1.000000e+00 : f32
    %135 = vector.broadcast %cst_23 : f32 to vector<2x8x1xf32>
    %136 = arith.maximumf %95, %135 : vector<2x8x1xf32>
    %137 = arith.divf %98, %136 : vector<2x8x1xf32>
    %cst_24 = arith.constant 1.000000e+00 : f32
    %138 = vector.broadcast %cst_24 : f32 to vector<2x8x1xf32>
    %139 = arith.maximumf %133, %138 : vector<2x8x1xf32>
    %140 = arith.divf %134, %139 : vector<2x8x1xf32>
    %cst_25 = arith.constant 1.000000e+00 : f32
    %141 = vector.broadcast %cst_25 : f32 to vector<2x8x1xf32>
    %142 = arith.addf %141, %137 : vector<2x8x1xf32>
    %143 = arith.subf %142, %140 : vector<2x8x1xf32>
    %cst_26 = arith.constant 0.000000e+00 : f32
    %144 = vector.broadcast %cst_26 : f32 to vector<2x8x1xf32>
    %145 = arith.maximumf %143, %144 : vector<2x8x1xf32>
    %cst_27 = arith.constant 5.000000e-01 : f32
    %146 = vector.broadcast %cst_27 : f32 to vector<2x8x1xf32>
    %147 = arith.cmpf ogt, %95, %146 : vector<2x8x1xf32>
    %cst_28 = arith.constant 5.000000e-01 : f32
    %148 = vector.broadcast %cst_28 : f32 to vector<2x8x1xf32>
    %149 = arith.cmpf ogt, %133, %148 : vector<2x8x1xf32>
    %150 = arith.andi %147, %149 : vector<2x8x1xi1>
    %cst_29 = arith.constant 0.000000e+00 : f32
    %151 = vector.broadcast %cst_29 : f32 to vector<2x8x1xf32>
    %152 = arith.select %150, %145, %151 : vector<2x8x1xi1>, vector<2x8x1xf32>
    %153 = vector.shape_cast %152 : vector<2x8x1xf32> to vector<1x2x8x1xf32>
    %cst_30 = arith.constant dense<0.000000e+00> : vector<1xf32>
    %154 = vector.multi_reduction <add>, %153, %cst_30 [1, 2, 3] : vector<1x2x8x1xf32> to vector<1xf32>
    %155 = vector.shape_cast %154 : vector<1xf32> to vector<1x1x1x1xf32>
    %156 = vector.extract %155[0, 0, 0, 0] : f32 from vector<1x1x1x1xf32>
    %157 = vector.broadcast %156 : f32 to vector<1x1xf32>
    %158 = arith.addf %62, %157 : vector<1x1xf32>
    %c1_i32 = arith.constant 1 : i32
    %159 = vector.shape_cast %158 : vector<1x1xf32> to vector<1x1x1xf32>
    %cst_31 = arith.constant dense<0.000000e+00> : vector<1xf32>
    %160 = vector.multi_reduction <add>, %159, %cst_31 [1, 2] : vector<1x1x1xf32> to vector<1xf32>
    %161 = vector.shape_cast %160 : vector<1xf32> to vector<1x1x1xf32>
    %162 = vector.extract %161[0, 0, 0] : f32 from vector<1x1x1xf32>
    %c0_32 = arith.constant 0 : index
    %163 = memref.load %arg4[%c0_32] : memref<1xf32, #tpu.memory_space<smem>>
    memref.store %162, %arg4[%c0_32] : memref<1xf32, #tpu.memory_space<smem>>
    return
  }
}

</mosaic_0001>

<bundles_post_ra>
// kernel: collision_loss.1
= control target key start
LH: loop header
LB: loop body
LE: loop exit
PB: predicated region body
PF: predicated region fallthrough
CT: control target
= control target key end

     0   :  { %v25_v0 = vlaneseq  ;;  %v3375_v1 = vmov 0.0   ;;  %vm3376_vm0 = vmmov 0   ;;  %vm34_vm1 = vcmask 1042432   ;;  %s3738_s0 = inlined_call_operand.vmem [shape: f32[2,3,128], index: 0, kind: input, shape index: {}]   ;;  %s3739_s1 = inlined_call_operand.vmem [shape: f32[2,1,3], index: 1, kind: input, shape index: {}]   ;;  %s3740_s2 = inlined_call_operand.vmem [shape: f32[2,1,128], index: 2, kind: input, shape index: {}]   ;;  %s3741_s3 = inlined_call_operand.vmem [shape: s32[1,128], index: 3, kind: input, shape index: {}]   ;;  %s3742_s4 = inlined_call_operand.hbm [shape: f32[1], index: 4, kind: output, shape index: {}]  }
   0x1   :  { %3137 = vmatprep.subr.mxu0 %v3375_v1  ;;  %3142 = vmatprep.subr.mxu1 %v3375_v1  ;;  %v3043_v2 = vld [vmem:[%s3741_s3] ss:$0 sm:$0xff] }
   0x2   :  { %v3418_v3 = vshrl.u32 %v25_v0, 7  ;;  %3139 = vmatprep.mubr.msk.f32.mxu0 %vm3376_vm0, %v3375_v1  ;;  %3144 = vmatprep.mubr.msk.f32.mxu1 %vm3376_vm0, %v3375_v1  ;;  %v3427_v4 = vld [vmem:[%s3738_s0] sm:$0x7] }
   0x3   :  { %9 = vsyncpa [#allocation3], 0  ;;  %v3432_v5 = vld [vmem:[%s3740_s2] sm:$0x1]  ;;  %v3377_v8 = vmov 1.0   ;;  %v35_v10 = vsel %vm34_vm1, %v3427_v4, 1.0 }
   0x4   :  { %vm3435_vm2 = vcmp.eq.s32.totalorder %v3043_v2, %v3418_v3  ;;  %v3440_v7 = vsub.s32 0, %v3418_v3  ;;  %v500_v39 = vsub.s32 3, %v3418_v3  ;;  %v3511_v42 = vld [vmem:[%s3740_s2 + $0x1] sm:$0x1]  ;;  %v3516_v43 = vld [vmem:[%s3738_s0 + $0x4] sm:$0x7] }
   0x5   :  { %3138 = vmatpush3.xpose.msk.msra.mxu0 %vm3435_vm2, %v3377_v8  ;;  %v3448_v9 = vsel %vm3435_vm2, 1.0, %v3375_v1  ;;  %v36_v45 = vsel %vm34_vm1, %v3516_v43, 1.0  ;;  %vm504_vm3 = vcmask 64512   ;;  %vm1898_vm6 = vcmask 1043456   ;;  %s3383_s26 = smov 3   ;;  %s3384_s27 = smov 4  }
   0x6   :  { %v3454_v11 = vsub.f32 %v3448_v9, %v3448_v9  ;;  %v3458_v12 = vrot.slane %v3432_v5, %v3440_v7  ;;  %3147 = vmatprep.subr.mxu0 %v3375_v1  ;;  %v3520_v44 = vrot.slane %v3511_v42, %v3440_v7  ;;  %s3385_s28 = smov 127   ;;  %s3386_s29 = smov 125  }
   0x7   :  { %s3387_s5 = smov [#allocation2]  }
   0x8   :  { %v3462_v13 = vand.u32 4294901760, %v3454_v11  ;;  %v3465_v14 = vmul.f32 %v3458_v12, %v35_v10  ;;  %v3525_v48 = vmul.f32 %v3520_v44, %v36_v45 }
   0xa   :  { %v161_v15 = vsub.f32 %v3454_v11, %v3462_v13  ;;  %v117_v16 = vand.u32 4294901760, %v3465_v14  ;;  %v1029_v52 = vand.u32 4294901760, %v3525_v48 }
   0xc   :  { %v3470_v17 = vand.u32 4294901760, %v161_v15  ;;  %v118_v18 = vsub.f32 %v3465_v14, %v117_v16  ;;  %v1030_v55 = vsub.f32 %v3525_v48, %v1029_v52 }
   0xe   :  { %3143 = vmatpush3.xpose.msra.mxu1 %v3470_v17  ;;  %v119_v19 = vand.u32 4294901760, %v118_v18  ;;  %v1031_v57 = vand.u32 4294901760, %v1030_v55 }
   0xf   :  { %3152 = vmatprep.subr.mxu1 %v3375_v1 }
  0x10   :  { %v120_v20 = vsub.f32 %v118_v18, %v119_v19  ;;  %v1032_v58 = vsub.f32 %v1030_v55, %v1031_v57 }
  0x11   :  { %3145 = vmatmul.mubr.f32.vlgmr.msra.gmra.mxu1 %v117_v16 }
  0x12   :  { %v121_v21 = vand.u32 4294901760, %v120_v20  ;;  %3153 = vmatpush3.xpose.msk.msra.mxu1 %vm3435_vm2, %v3377_v8  ;;  %3154 = vmatprep.mubr.msk.f32.mxu1 %vm3376_vm0, %v3375_v1  ;;  %v1033_v59 = vand.u32 4294901760, %v1032_v58 }
  0x13   :  { %3162 = vmatprep.subr.mxu1 %v3375_v1 }
  0x14   :  { %3140 = vmatmul.mubr.f32.vlgmr.msra.gmra.mxu0 %v121_v21 }
  0x15   :  { %3148 = vmatpush3.xpose.msra.mxu0 %v3454_v11  ;;  %3149 = vmatprep.mubr.msk.f32.mxu0 %vm3376_vm0, %v3375_v1 }
  0x16   :  { %3155 = vmatmul.mubr.f32.vlgmr.msra.gmra.mxu1 %v119_v19  ;;  %3157 = vmatprep.subr.mxu0 %v3375_v1 }
  0x17   :  { %3163 = vmatpush3.xpose.msk.msra.mxu1 %vm3435_vm2, %v3377_v8  ;;  %3164 = vmatprep.mubr.msk.f32.mxu1 %vm3376_vm0, %v3375_v1 }
  0x18   :  { %3150 = vmatmul.mubr.f32.vlgmr.msra.gmra.mxu0 %v118_v18  ;;  %3172 = vmatprep.subr.mxu1 %v3375_v1 }
  0x19   :  { %3158 = vmatpush3.xpose.msra.mxu0 %v3462_v13  ;;  %3159 = vmatprep.mubr.msk.f32.mxu0 %vm3376_vm0, %v3375_v1 }
  0x1a   :  { %3165 = vmatmul.mubr.f32.vlgmr.msra.gmra.mxu1 %v117_v16  ;;  %3167 = vmatprep.subr.mxu0 %v3375_v1 }
  0x1b   :  { %3173 = vmatpush3.msra.mxu1 %v3470_v17  ;;  %3174 = vmatprep.mubr.msk.f32.mxu1 %vm3376_vm0, %v3375_v1 }
  0x1c   :  { %3160 = vmatmul.mubr.f32.vlgmr.msra.gmra.mxu0 %v117_v16  ;;  %3182 = vmatprep.subr.mxu1 %v3375_v1 }
  0x1d   :  { %3168 = vmatpush3.msk.msra.mxu0 %vm3435_vm2, %v3377_v8  ;;  %3169 = vmatprep.mubr.msk.f32.mxu0 %vm3376_vm0, %v3375_v1 }
  0x1e   :  { %3177 = vmatprep.subr.mxu0 %v3375_v1 }
  0xd1   :  { %v199_v22 = vpop.f32.mrf.mxu1 }
  0xd3   :  { %v3146_v23 = vpop.f32.mrf.mxu1 }
  0xd4   :  { %v123_v24 = vpop.f32.mrf.mxu0 }
  0xd5   :  { %v200_v27 = vadd.f32 %v199_v22, %v123_v24 }
  0xd6   :  { %v3141_v25 = vpop.f32.mrf.mxu0  ;;  %v347_v26 = vpop.f32.mrf.mxu1 }
  0xd8   :  { %v273_v28 = vpop.f32.mrf.mxu0  ;;  %v3156_v29 = vpop.f32.mrf.mxu1 }
  0xd9   :  { %v274_v30 = vadd.f32 %v273_v28, %v200_v27 }
  0xda   :  { %v3151_v31 = vpop.f32.mrf.mxu0  ;;  %v493_v32 = vpop.f32.mrf.mxu1 }
  0xdb   :  { %v348_v33 = vadd.f32 %v347_v26, %v274_v30 }
  0xdc   :  { %v421_v34 = vpop.f32.mrf.mxu0  ;;  %v3166_v35 = vpop.f32.mrf.mxu1 }
  0xdd   :  { %v422_v36 = vadd.f32 %v421_v34, %v348_v33 }
  0xde   :  { %v3161_v37 = vpop.f32.mrf.mxu0 }
  0xdf   :  { %v494_v38 = vadd.f32 %v493_v32, %v422_v36 }
  0xe1   :  { %v497_v40 = vmax.f32 %v494_v38, 1.0 }
  0xe3   :  { %v501_v41 = vrot.slane %v497_v40, %v500_v39 }
  0xe5   :  { %3341 = vrcp.f32 %v501_v41 }
  0xf2   :  { %v3342_v46 = vpop.eup %3341 }
  0xf3   :  { %v503_v47 = vmul.f32 %v3342_v46, %v494_v38 }
  0xf5   :  { %v506_v49 = vsel %vm504_vm3, %v503_v47, 0 }
  0xf6   :  { %v574_v50 = vand.u32 4294901760, %v506_v49 }
  0xf8   :  { %v575_v51 = vsub.f32 %v506_v49, %v574_v50  ;;  %3175 = vmatmul.mubr.f32.vlgmr.msra.gmra.mxu1 %v574_v50 }
  0xf9   :  { %3183 = vmatpush3.msk.msra.mxu1 %vm3435_vm2, %v3377_v8  ;;  %3184 = vmatprep.mubr.msk.f32.mxu1 %vm3376_vm0, %v3375_v1 }
  0xfa   :  { %v576_v53 = vand.u32 4294901760, %v575_v51  ;;  %3192 = vmatprep.subr.mxu1 %v3375_v1 }
  0xfc   :  { %3185 = vmatmul.mubr.f32.vlgmr.msra.gmra.mxu1 %v576_v53  ;;  %v577_v54 = vsub.f32 %v575_v51, %v576_v53 }
  0xfd   :  { %3193 = vmatpush3.msk.msra.mxu1 %vm3435_vm2, %v3377_v8  ;;  %3194 = vmatprep.mubr.msk.f32.mxu1 %vm3376_vm0, %v3375_v1 }
  0xfe   :  { %v578_v56 = vand.u32 4294901760, %v577_v54  ;;  %3202 = vmatprep.subr.mxu1 %v3375_v1 }
 0x100   :  { %3170 = vmatmul.mubr.f32.vlgmr.msra.gmra.mxu0 %v578_v56  ;;  %3195 = vmatmul.mubr.f32.vlgmr.msra.gmra.mxu1 %v574_v50 }
 0x101   :  { %3178 = vmatpush3.msra.mxu0 %v3454_v11  ;;  %3179 = vmatprep.mubr.msk.f32.mxu0 %vm3376_vm0, %v3375_v1 }
 0x102   :  { %3187 = vmatprep.subr.mxu0 %v3375_v1  ;;  %3203 = vmatpush3.xpose.msra.mxu1 %v3470_v17 }
 0x103   :  { %3204 = vmatprep.mubr.msk.f32.mxu1 %vm3376_vm0, %v3375_v1  ;;  %3212 = vmatprep.subr.mxu1 %v3375_v1 }
 0x104   :  { %3180 = vmatmul.mubr.f32.vlgmr.msra.gmra.mxu0 %v575_v51 }
 0x105   :  { %3188 = vmatpush3.msra.mxu0 %v3462_v13  ;;  %3189 = vmatprep.mubr.msk.f32.mxu0 %vm3376_vm0, %v3375_v1 }
 0x106   :  { %3197 = vmatprep.subr.mxu0 %v3375_v1  ;;  %3205 = vmatmul.mubr.f32.vlgmr.msra.gmra.mxu1 %v1029_v52 }
 0x107   :  { %3213 = vmatpush3.xpose.msk.msra.mxu1 %vm3435_vm2, %v3377_v8  ;;  %3214 = vmatprep.mubr.msk.f32.mxu1 %vm3376_vm0, %v3375_v1 }
 0x108   :  { %3190 = vmatmul.mubr.f32.vlgmr.msra.gmra.mxu0 %v574_v50  ;;  %3222 = vmatprep.subr.mxu1 %v3375_v1 }
 0x109   :  { %3198 = vmatpush3.xpose.msk.msra.mxu0 %vm3435_vm2, %v3377_v8  ;;  %3199 = vmatprep.mubr.msk.f32.mxu0 %vm3376_vm0, %v3375_v1 }
 0x10a   :  { %3207 = vmatprep.subr.mxu0 %v3375_v1  ;;  %3215 = vmatmul.mubr.f32.vlgmr.msra.gmra.mxu1 %v1031_v57 }
 0x10b   :  { %3223 = vmatpush3.xpose.msk.msra.mxu1 %vm3435_vm2, %v3377_v8  ;;  %3224 = vmatprep.mubr.msk.f32.mxu1 %vm3376_vm0, %v3375_v1 }
 0x10c   :  { %3200 = vmatmul.mubr.f32.vlgmr.msra.gmra.mxu0 %v1033_v59  ;;  %3232 = vmatprep.subr.mxu1 %v3375_v1 }
 0x10d   :  { %3208 = vmatpush3.xpose.msra.mxu0 %v3454_v11  ;;  %3209 = vmatprep.mubr.msk.f32.mxu0 %vm3376_vm0, %v3375_v1 }
 0x10e   :  { %3217 = vmatprep.subr.mxu0 %v3375_v1  ;;  %3225 = vmatmul.mubr.f32.vlgmr.msra.gmra.mxu1 %v1029_v52 }
 0x10f   :  { %3233 = vmatpush3.msra.mxu1 %v3470_v17  ;;  %3234 = vmatprep.mubr.msk.f32.mxu1 %vm3376_vm0, %v3375_v1 }
 0x110   :  { %3210 = vmatmul.mubr.f32.vlgmr.msra.gmra.mxu0 %v1030_v55  ;;  %3242 = vmatprep.subr.mxu1 %v3375_v1 }
 0x111   :  { %3218 = vmatpush3.xpose.msra.mxu0 %v3462_v13  ;;  %3219 = vmatprep.mubr.msk.f32.mxu0 %vm3376_vm0, %v3375_v1 }
 0x112   :  { %3227 = vmatprep.subr.mxu0 %v3375_v1 }
 0x114   :  { %3220 = vmatmul.mubr.f32.vlgmr.msra.gmra.mxu0 %v1029_v52 }
 0x115   :  { %3228 = vmatpush3.msk.msra.mxu0 %vm3435_vm2, %v3377_v8  ;;  %3229 = vmatprep.mubr.msk.f32.mxu0 %vm3376_vm0, %v3375_v1 }
 0x116   :  { %3237 = vmatprep.subr.mxu0 %v3375_v1 }
 0x1b8   :  { %v656_v60 = vpop.f32.mrf.mxu1 }
 0x1ba   :  { %v3176_v61 = vpop.f32.mrf.mxu1 }
 0x1bc   :  { %v804_v62 = vpop.f32.mrf.mxu1 }
 0x1be   :  { %v3186_v63 = vpop.f32.mrf.mxu1 }
 0x1c0   :  { %v580_v0 = vpop.f32.mrf.mxu0  ;;  %v950_v2 = vpop.f32.mrf.mxu1 }
 0x1c1   :  { %v657_v16 = vadd.f32 %v656_v60, %v580_v0 }
 0x1c2   :  { %v3171_v10 = vpop.f32.mrf.mxu0  ;;  %v3196_v15 = vpop.f32.mrf.mxu1 }
 0x1c4   :  { %v730_v18 = vpop.f32.mrf.mxu0 }
 0x1c5   :  { %v731_v19 = vadd.f32 %v730_v18, %v657_v16 }
 0x1c6   :  { %v3181_v20 = vpop.f32.mrf.mxu0  ;;  %v1111_v21 = vpop.f32.mrf.mxu1 }
 0x1c7   :  { %v805_v22 = vadd.f32 %v804_v62, %v731_v19 }
 0x1c8   :  { %v878_v23 = vpop.f32.mrf.mxu0  ;;  %v3206_v24 = vpop.f32.mrf.mxu1 }
 0x1c9   :  { %v879_v25 = vadd.f32 %v878_v23, %v805_v22 }
 0x1ca   :  { %v3191_v26 = vpop.f32.mrf.mxu0  ;;  %v1259_v27 = vpop.f32.mrf.mxu1 }
 0x1cb   :  { %v951_v28 = vadd.f32 %v950_v2, %v879_v25  ;;  %v3378_v26 = vmov 3  }
 0x1cc   :  { %v1035_v29 = vpop.f32.mrf.mxu0  ;;  %v3216_v30 = vpop.f32.mrf.mxu1  ;;  %3332 = vset.pattern.permute.xlu0 %v3378_v26 }
 0x1cd   :  { %v954_v31 = vsub.f32 %v3427_v4, %v951_v28  ;;  %v1112_v35 = vadd.f32 %v1111_v21, %v1035_v29 }
 0x1ce   :  { %v3201_v32 = vpop.f32.mrf.mxu0  ;;  %v1405_v33 = vpop.f32.mrf.mxu1 }
 0x1cf   :  { %v955_v34 = vmul.f32 %v954_v31, %v954_v31 }
 0x1d0   :  { %v1185_v36 = vpop.f32.mrf.mxu0  ;;  %v3226_v37 = vpop.f32.mrf.mxu1 }
 0x1d1   :  { %v957_v38 = vrot.slane %v955_v34, 1  ;;  %v1186_v40 = vadd.f32 %v1185_v36, %v1112_v35  ;;  %v960_v46 = vrot.slane %v955_v34, 2 }
 0x1d2   :  { %v3211_v41 = vpop.f32.mrf.mxu0 }
 0x1d3   :  { %v959_v45 = vadd.f32 %v957_v38, %v955_v34  ;;  %v1260_v47 = vadd.f32 %v1259_v27, %v1186_v40 }
 0x1d4   :  { %v1333_v49 = vpop.f32.mrf.mxu0 }
 0x1d5   :  { %v962_v50 = vadd.f32 %v960_v46, %v959_v45  ;;  %v1334_v51 = vadd.f32 %v1333_v49, %v1260_v47 }
 0x1d6   :  { %v3221_v52 = vpop.f32.mrf.mxu0 }
 0x1d7   :  { %3343 = vrsqrt.f32 %v962_v50  ;;  %v1406_v53 = vadd.f32 %v1405_v33, %v1334_v51  ;;  %v1874_v54 = vmul.f32 %v962_v50, %v3432_v5  ;;  %vm1878_vm4 = vcmp.eq.f32.partialorder %v962_v50, inf }
 0x1d8   :  { %v1881_v61 = vand.u32 2147483648, %v962_v50  ;;  %vm1880_vm5 = vcmp.eq.f32.partialorder %v962_v50, 0.0 }
 0x1d9   :  { %v1409_v55 = vmax.f32 %v1406_v53, 1.0  ;;  %v2814_v56 = vrot.slane %v1874_v54, %v3440_v7 }
 0x1db   :  { %v1413_v57 = vrot.slane %v1409_v55, %v500_v39  ;;  %v2819_v58 = vmul.f32 %v3448_v9, %v2814_v56 }
 0x1dd   :  { %3345 = vrcp.f32 %v1413_v57  ;;  %2821 = vmax.xlane.f32.xlu1 %v2819_v58 }
 0x1e4   :  { %v3344_v59 = vpop.eup %3343 }
 0x1e5   :  { %v1877_v60 = vmul.f32 %v3344_v59, %v962_v50 }
 0x1e7   :  { %v1879_v62 = vsel %vm1878_vm4, %v962_v50, %v1877_v60 }
 0x1e8   :  { %v1882_v63 = vsel %vm1880_vm5, %v1881_v61, %v1879_v62 }
 0x1e9   :  { %v1890_v0 = vmul.f32 %v1882_v63, %v3432_v5 }
 0x1ea   :  { %v3346_v2 = vpop.eup %3345 }
 0x1eb   :  { %v1415_v10 = vmul.f32 %v3346_v2, %v1406_v53  ;;  %v1894_v15 = vrot.slane %v1890_v0, 4 }
 0x1ed   :  { %v1417_v16 = vsel %vm504_vm3, %v1415_v10, 0  ;;  %v1899_v39 = vsel %vm1898_vm6, %v3465_v14, %v1894_v15 }
 0x1ee   :  { %v1485_v18 = vand.u32 4294901760, %v1417_v16  ;;  %v1934_v19 = vand.u32 4294901760, %v1899_v39 }
 0x1f0   :  { %v1486_v20 = vsub.f32 %v1417_v16, %v1485_v18  ;;  %3235 = vmatmul.mubr.f32.vlgmr.msra.gmra.mxu1 %v1485_v18  ;;  %v2011_v21 = vsub.f32 %v1899_v39, %v1934_v19 }
 0x1f1   :  { %3243 = vmatpush3.msk.msra.mxu1 %vm3435_vm2, %v3377_v8  ;;  %3244 = vmatprep.mubr.msk.f32.mxu1 %vm3376_vm0, %v3375_v1 }
 0x1f2   :  { %v1487_v5 = vand.u32 4294901760, %v1486_v20  ;;  %3252 = vmatprep.subr.mxu1 %v3375_v1  ;;  %v2012_v22 = vand.u32 4294901760, %v2011_v21 }
 0x1f4   :  { %3245 = vmatmul.mubr.f32.vlgmr.msra.gmra.mxu1 %v1487_v5  ;;  %v1488_v23 = vsub.f32 %v1486_v20, %v1487_v5  ;;  %v2013_v24 = vsub.f32 %v2011_v21, %v2012_v22 }
 0x1f5   :  { %3253 = vmatpush3.msk.msra.mxu1 %vm3435_vm2, %v3377_v8  ;;  %3254 = vmatprep.mubr.msk.f32.mxu1 %vm3376_vm0, %v3375_v1 }
 0x1f6   :  { %3262 = vmatprep.subr.mxu1 %v3375_v1  ;;  %v1489_v14 = vand.u32 4294901760, %v1488_v23  ;;  %v2014_v25 = vand.u32 4294901760, %v2013_v24 }
 0x1f8   :  { %3230 = vmatmul.mubr.f32.vlgmr.msra.gmra.mxu0 %v1489_v14  ;;  %3255 = vmatmul.mubr.f32.vlgmr.msra.gmra.mxu1 %v1485_v18 }
 0x1f9   :  { %3263 = vmatpush3.xpose.msra.mxu1 %v2014_v25  ;;  %3238 = vmatpush3.msra.mxu0 %v3454_v11 }
 0x1fa   :  { %3239 = vmatprep.mubr.msk.f32.mxu0 %vm3376_vm0, %v3375_v1  ;;  %3264 = vmatprep.mubr.msk.f32.mxu1 %vm3376_vm0, %v3375_v1 }
 0x1fb   :  { %3272 = vmatprep.subr.mxu1 %v3375_v1  ;;  %3247 = vmatprep.subr.mxu0 %v3375_v1 }
 0x1fc   :  { %3240 = vmatmul.mubr.f32.vlgmr.msra.gmra.mxu0 %v1486_v20  ;;  %3265 = vmatmul.mubr.msk.f32.vlgmr.msra.gmra.mxu1 %vm3435_vm2, %v3377_v8 }
 0x1fd   :  { %3273 = vmatpush3.xpose.msra.mxu1 %v1934_v19  ;;  %3248 = vmatpush3.msra.mxu0 %v3462_v13 }
 0x1fe   :  { %3249 = vmatprep.mubr.msk.f32.mxu0 %vm3376_vm0, %v3375_v1  ;;  %3257 = vmatprep.subr.mxu0 %v3375_v1 }
 0x1ff   :  { %3274 = vmatprep.mubr.msk.f32.mxu1 %vm3376_vm0, %v3375_v1  ;;  %3282 = vmatprep.subr.mxu1 %v3375_v1 }
 0x200   :  { %3250 = vmatmul.mubr.f32.vlgmr.msra.gmra.mxu0 %v1485_v18  ;;  %3275 = vmatmul.mubr.f32.vlgmr.msra.gmra.mxu1 %v3462_v13 }
 0x201   :  { %3258 = vmatpush3.xpose.msra.mxu0 %v1934_v19  ;;  %3283 = vmatpush3.xpose.msra.mxu1 %v1934_v19 }
 0x202   :  { %3259 = vmatprep.mubr.msk.f32.mxu0 %vm3376_vm0, %v3375_v1  ;;  %3267 = vmatprep.subr.mxu0 %v3375_v1 }
 0x203   :  { %3284 = vmatprep.mubr.msk.f32.mxu1 %vm3376_vm0, %v3375_v1  ;;  %3292 = vmatprep.subr.mxu1 %v3375_v1 }
 0x204   :  { %3260 = vmatmul.mubr.f32.vlgmr.msra.gmra.mxu0 %v3470_v17  ;;  %3285 = vmatmul.mubr.msk.f32.vlgmr.msra.gmra.mxu1 %vm3435_vm2, %v3377_v8 }
 0x205   :  { %3268 = vmatpush3.xpose.msra.mxu0 %v2011_v21  ;;  %3269 = vmatprep.mubr.msk.f32.mxu0 %vm3376_vm0, %v3375_v1 }
 0x206   :  { %3277 = vmatprep.subr.mxu0 %v3375_v1  ;;  %3294 = vmatprep.mubr.msk.f32.mxu1 %vm3376_vm0, %v3375_v1 }
 0x208   :  { %3270 = vmatmul.mubr.f32.vlgmr.msra.gmra.mxu0 %v3454_v11 }
 0x209   :  { %3278 = vmatpush3.xpose.msra.mxu0 %v2012_v22  ;;  %3279 = vmatprep.mubr.msk.f32.mxu0 %vm3376_vm0, %v3375_v1 }
 0x20a   :  { %3287 = vmatprep.subr.mxu0 %v3375_v1 }
 0x20c   :  { %3280 = vmatmul.mubr.msk.f32.vlgmr.msra.gmra.mxu0 %vm3435_vm2, %v3377_v8 }
 0x20d   :  { %3289 = vmatprep.mubr.msk.f32.mxu0 %vm3376_vm0, %v3375_v1 }
 0x2b0   :  { %v1567_v27 = vpop.f32.mrf.mxu1 }
 0x2b2   :  { %v3236_v28 = vpop.f32.mrf.mxu1 }
 0x2b4   :  { %v1715_v29 = vpop.f32.mrf.mxu1 }
 0x2b6   :  { %v3246_v30 = vpop.f32.mrf.mxu1 }
 0x2b8   :  { %v1491_v31 = vpop.f32.mrf.mxu0  ;;  %v1861_v32 = vpop.f32.mrf.mxu1 }
 0x2b9   :  { %v1568_v35 = vadd.f32 %v1567_v27, %v1491_v31 }
 0x2ba   :  { %v3231_v33 = vpop.f32.mrf.mxu0  ;;  %v3256_v34 = vpop.f32.mrf.mxu1 }
 0x2bc   :  { %v1641_v36 = vpop.f32.mrf.mxu0  ;;  %v2051_v37 = vpop.f32.mrf.mxu1 }
 0x2bd   :  { %v1642_v38 = vadd.f32 %v1641_v36, %v1568_v35 }
 0x2be   :  { %v3241_v40 = vpop.f32.mrf.mxu0  ;;  %v3266_v41 = vpop.f32.mrf.mxu1 }
 0x2bf   :  { %v1716_v45 = vadd.f32 %v1715_v29, %v1642_v38 }
 0x2c0   :  { %v1789_v46 = vpop.f32.mrf.mxu0  ;;  %v2199_v47 = vpop.f32.mrf.mxu1 }
 0x2c1   :  { %v1790_v49 = vadd.f32 %v1789_v46, %v1716_v45 }
 0x2c2   :  { %v3251_v50 = vpop.f32.mrf.mxu0  ;;  %v3276_v51 = vpop.f32.mrf.mxu1 }
 0x2c3   :  { %v1862_v52 = vadd.f32 %v1861_v32, %v1790_v49 }
 0x2c4   :  { %v1975_v53 = vpop.f32.mrf.mxu0  ;;  %v2345_v54 = vpop.f32.mrf.mxu1 }
 0x2c5   :  { %v1865_v55 = vsub.f32 %v3516_v43, %v1862_v52  ;;  %v2052_v56 = vadd.f32 %v2051_v37, %v1975_v53 }
 0x2c6   :  { %v3261_v57 = vpop.f32.mrf.mxu0  ;;  %v3286_v58 = vpop.f32.mrf.mxu1 }
 0x2c7   :  { %v1866_v59 = vmul.f32 %v1865_v55, %v1865_v55 }
 0x2c8   :  { %v2125_v60 = vpop.f32.mrf.mxu0 }
 0x2c9   :  { %v1868_v61 = vrot.slane %v1866_v59, 1  ;;  %v2126_v62 = vadd.f32 %v2125_v60, %v2052_v56  ;;  %v1871_v2 = vrot.slane %v1866_v59, 2  ;;  %v3381_v60 = vmov 2  }
 0x2ca   :  { %v3271_v63 = vpop.f32.mrf.mxu0 }
 0x2cb   :  { %v1870_v0 = vadd.f32 %v1868_v61, %v1866_v59  ;;  %v2200_v10 = vadd.f32 %v2199_v47, %v2126_v62  ;;  %v3380_v59 = vmov 1  }
 0x2cc   :  { %v2273_v15 = vpop.f32.mrf.mxu0 }
 0x2cd   :  { %v1873_v16 = vadd.f32 %v1871_v2, %v1870_v0  ;;  %v2274_v39 = vadd.f32 %v2273_v15, %v2200_v10  ;;  %v2822_v15 = vpop.xlane.xlu1 %2821 }
 0x2ce   :  { %v3281_v18 = vpop.f32.mrf.mxu0 }
 0x2cf   :  { %v1875_v19 = vmul.f32 %v1873_v16, %v3511_v42  ;;  %3347 = vrsqrt.f32 %v1873_v16  ;;  %v3656_v20 = vadd.f32 %v2345_v54, %v2274_v39  ;;  %vm1885_vm7 = vcmp.eq.f32.partialorder %v1873_v16, inf }
 0x2d0   :  { %v1888_v14 = vand.u32 2147483648, %v1873_v16  ;;  %vm1887_vm8 = vcmp.eq.f32.partialorder %v1873_v16, 0.0  ;;  %v2861_v18 = vsub.s32 1, %v3418_v3 }
 0x2d1   :  { %v2818_v21 = vrot.slane %v1875_v19, %v3440_v7  ;;  %v2795_v5 = vmax.f32 %v3656_v20, 1.0  ;;  %v2879_v19 = vsub.s32 2, %v3418_v3  ;;  %vm2980_vm5 = vcmp.gt.f32.partialorder %v3656_v20, 0.5 }
 0x2d3   :  { %v2820_v22 = vmul.f32 %v3448_v9, %v2818_v21  ;;  %2799 = vperm.xlu0 %3332, %v2795_v5  }
 0x2d5   :  { %2823 = vmax.xlane.f32.xlu1 %v2820_v22  ;;  %v2842_v22 = vrot.slane %v3427_v4, %v3440_v7 }
 0x2dc   :  { %v3348_v23 = vpop.eup %3347 }
 0x2dd   :  { %v1884_v24 = vmul.f32 %v3348_v23, %v1873_v16 }
 0x2df   :  { %v1886_v25 = vsel %vm1885_vm7, %v1873_v16, %v1884_v24  ;;  %v2866_v24 = vrot.slane %v3516_v43, %v2861_v18  ;;  %vm3011_vm7 = vcmask 7168  }
 0x2e0   :  { %v1889_v26 = vsel %vm1887_vm8, %v1888_v14, %v1886_v25  ;;  %v2880_v14 = vrot.slane %v3427_v4, %v2879_v19  ;;  %v2862_v25 = vrot.slane %v3427_v4, %v2861_v18 }
 0x2e1   :  { %v1891_v27 = vmul.f32 %v1889_v26, %v3511_v42  ;;  %v2846_v26 = vrot.slane %v3516_v43, %v3440_v7 }
 0x2e3   :  { %v1895_v28 = vrot.slane %v1891_v27, 4 }
 0x2e5   :  { %v1900_v29 = vsel %vm1898_vm6, %v3525_v48, %v1895_v28  ;;  %v23_v48 = vld [vmem:[%s3739_s1] sm:$0x1] }
 0x2e6   :  { %v2380_v30 = vand.u32 4294901760, %v1900_v29 }
 0x2e8   :  { %3288 = vmatpush3.xpose.msra.mxu0 %v2380_v30  ;;  %v2457_v9 = vsub.f32 %v1900_v29, %v2380_v30 }
 0x2e9   :  { %3297 = vmatprep.subr.mxu0 %v3375_v1 }
 0x2ea   :  { %v2458_v31 = vand.u32 4294901760, %v2457_v9 }
 0x2eb   :  { %3290 = vmatmul.mubr.f32.vlgmr.msra.gmra.mxu0 %v3470_v17 }
 0x2ec   :  { %3298 = vmatpush3.xpose.msra.mxu0 %v2457_v9  ;;  %3299 = vmatprep.mubr.msk.f32.mxu0 %vm3376_vm0, %v3375_v1  ;;  %v2459_v32 = vsub.f32 %v2457_v9, %v2458_v31 }
 0x2ed   :  { %3307 = vmatprep.subr.mxu0 %v3375_v1 }
 0x2ee   :  { %v2460_v42 = vand.u32 4294901760, %v2459_v32  ;;  %v2884_v32 = vrot.slane %v3516_v43, %v2879_v19 }
 0x2ef   :  { %3300 = vmatmul.mubr.f32.vlgmr.msra.gmra.mxu0 %v3454_v11  ;;  %v3379_v11 = vmov 0  }
 0x2f0   :  { %3293 = vmatpush3.xpose.msra.mxu1 %v2460_v42  ;;  %3308 = vmatpush3.xpose.msra.mxu0 %v2458_v31 }
 0x2f1   :  { %3302 = vmatprep.subr.mxu1 %v3375_v1  ;;  %3309 = vmatprep.mubr.msk.f32.mxu0 %vm3376_vm0, %v3375_v1 }
 0x2f2   :  { %3333 = vset.pattern.permute.xlu1 %v3379_v11 }
 0x2f3   :  { %3295 = vmatmul.mubr.msk.f32.vlgmr.msra.gmra.mxu1 %vm3435_vm2, %v3377_v8  ;;  %3310 = vmatmul.mubr.msk.f32.vlgmr.msra.gmra.mxu0 %vm3435_vm2, %v3377_v8 }
 0x2f4   :  { %3303 = vmatpush3.xpose.msra.mxu1 %v2380_v30  ;;  %3304 = vmatprep.mubr.msk.f32.mxu1 %vm3376_vm0, %v3375_v1 }
 0x2f5   :  { %3312 = vmatprep.subr.mxu1 %v3375_v1 }
 0x2f7   :  { %3305 = vmatmul.mubr.f32.vlgmr.msra.gmra.mxu1 %v3462_v13  ;;  %v24_v13 = vld [vmem:[%s3739_s1 + $0x1] sm:$0x1]  ;;  %s3382_s1 = smov 1  }
 0x2f8   :  { %3313 = vmatpush3.xpose.msra.mxu1 %v2380_v30  ;;  %3314 = vmatprep.mubr.msk.f32.mxu1 %vm3376_vm0, %v3375_v1  ;;  %v1902_v33 = vsub.f32 %v23_v48, %v24_v13  ;;  %v1901_v62 = vsub.f32 %v24_v13, %v23_v48 }
 0x2fa   :  { %v2834_v34 = vrot.slane %v1902_v33, %v3440_v7  ;;  %v2830_v63 = vrot.slane %v1901_v62, %v3440_v7 }
 0x2fb   :  { %3315 = vmatmul.mubr.msk.f32.vlgmr.msra.gmra.mxu1 %vm3435_vm2, %v3377_v8 }
 0x34e   :  { %v2800_v17 = vpop.permute.xlu0 %2799 }
 0x34f   :  { %3349 = vrcp.f32 %v2800_v17 }
 0x35c   :  { %v3350_v35 = vpop.eup %3349 }
 0x35d   :  { %v2808_v6 = vmul.f32 %v3350_v35, %v3656_v20 }
 0x35e   :  { %v2824_v16 = vpop.xlane.xlu1 %2823 }
 0x35f   :  { %v2838_v8 = vadd.f32 %v2834_v34, %v2808_v6 }
 0x361   :  { %2854 = vperm.xlu1 %3333, %v2838_v8  }
 0x365   :  { %3338 = vset.pattern.permute.xlu1 %v3381_v60 }
 0x3ab   :  { %v2421_v36 = vpop.f32.mrf.mxu0 }
 0x3ad   :  { %v3291_v37 = vpop.f32.mrf.mxu0 }
 0x3af   :  { %v2571_v38 = vpop.f32.mrf.mxu0 }
 0x3b1   :  { %v3301_v40 = vpop.f32.mrf.mxu0 }
 0x3b3   :  { %v2497_v41 = vpop.f32.mrf.mxu1  ;;  %v2719_v45 = vpop.f32.mrf.mxu0 }
 0x3b4   :  { %v2498_v46 = vadd.f32 %v2497_v41, %v2421_v36 }
 0x3b5   :  { %v3296_v47 = vpop.f32.mrf.mxu1  ;;  %v3311_v49 = vpop.f32.mrf.mxu0 }
 0x3b6   :  { %v2572_v50 = vadd.f32 %v2571_v38, %v2498_v46 }
 0x3b7   :  { %v2645_v51 = vpop.f32.mrf.mxu1 }
 0x3b8   :  { %v2646_v52 = vadd.f32 %v2645_v51, %v2572_v50 }
 0x3b9   :  { %v3306_v53 = vpop.f32.mrf.mxu1 }
 0x3ba   :  { %v2720_v54 = vadd.f32 %v2719_v45, %v2646_v52 }
 0x3bb   :  { %v2791_v55 = vpop.f32.mrf.mxu1 }
 0x3bc   :  { %v3699_v56 = vadd.f32 %v2791_v55, %v2720_v54 }
 0x3bd   :  { %v3316_v57 = vpop.f32.mrf.mxu1 }
 0x3be   :  { %v2796_v58 = vmax.f32 %v3699_v56, 1.0  ;;  %vm2979_vm2 = vcmp.gt.f32.partialorder %v3699_v56, 0.5 }
 0x3c0   :  { %2804 = vperm.xlu0 %3332, %v2796_v58  }
 0x3c4   :  { %3334 = vset.pattern.permute.xlu0 %v3380_v59 }
 0x3c5   :  { %2872 = vperm.xlu0 %3334, %v2838_v8  }
 0x3c9   :  { %3335 = vset.pattern.permute.xlu0 %v3379_v11 }
 0x3dc   :  { %v2855_v21 = vpop.permute.xlu1 %2854 }
 0x3dd   :  { %v2858_v31 = vsub.f32 %v2846_v26, %v2855_v21 }
 0x3df   :  { %v2896_v4 = vmul.f32 %v2858_v31, %v2858_v31 }
 0x43b   :  { %v2805_v61 = vpop.permute.xlu0 %2804 }
 0x43c   :  { %3351 = vrcp.f32 %v2805_v61 }
 0x440   :  { %v2873_v39 = vpop.permute.xlu0 %2872 }
 0x441   :  { %v2876_v29 = vsub.f32 %v2866_v24, %v2873_v39 }
 0x443   :  { %v2898_v48 = vmul.f32 %v2876_v29, %v2876_v29 }
 0x445   :  { %v2900_v7 = vadd.f32 %v2898_v48, %v2896_v4 }
 0x449   :  { %v3352_v0 = vpop.eup %3351 }
 0x44a   :  { %v2810_v2 = vmul.f32 %v3352_v0, %v3699_v56 }
 0x44c   :  { %v2837_v10 = vadd.f32 %v2830_v63, %v2810_v2 }
 0x44e   :  { %2886 = vperm.xlu1 %3338, %v2837_v10   ;;  %2849 = vperm.xlu0 %3335, %v2837_v10  }
 0x452   :  { %3339 = vset.pattern.permute.xlu1 %v3379_v11  ;;  %3336 = vset.pattern.permute.xlu0 %v3380_v59 }
 0x453   :  { %2907 = vperm.xlu1 %3339, %v2824_v16   ;;  %2868 = vperm.xlu0 %3336, %v2837_v10  }
 0x457   :  { %2912 = vperm.xlu1 %3339, %v2822_v15   ;;  %3337 = vset.pattern.permute.xlu0 %v3381_v60 }
 0x458   :  { %2890 = vperm.xlu0 %3337, %v2838_v8  }
 0x45c   :  { %3340 = vset.pattern.permute.xlu0 %v3379_v11 }
 0x4c9   :  { %v2850_v23 = vpop.permute.xlu0 %2849  ;;  %v2887_v27 = vpop.permute.xlu1 %2886 }
 0x4ca   :  { %v2857_v28 = vsub.f32 %v2842_v22, %v2850_v23  ;;  %v2893_v9 = vsub.f32 %v2880_v14, %v2887_v27 }
 0x4cc   :  { %v2895_v42 = vmul.f32 %v2857_v28, %v2857_v28  ;;  %v2901_v13 = vmul.f32 %v2893_v9, %v2893_v9 }
 0x4ce   :  { %v2869_v30 = vpop.permute.xlu0 %2868  ;;  %v2908_v33 = vpop.permute.xlu1 %2907 }
 0x4cf   :  { %v2875_v3 = vsub.f32 %v2862_v25, %v2869_v30 }
 0x4d1   :  { %v2897_v17 = vmul.f32 %v2875_v3, %v2875_v3 }
 0x4d2   :  { %v2913_v40 = vpop.permute.xlu1 %2912 }
 0x4d3   :  { %v2899_v34 = vadd.f32 %v2897_v17, %v2895_v42  ;;  %v2891_v35 = vpop.permute.xlu0 %2890 }
 0x4d4   :  { %v2894_v6 = vsub.f32 %v2884_v32, %v2891_v35 }
 0x4d5   :  { %v2903_v8 = vadd.f32 %v2901_v13, %v2899_v34 }
 0x4d6   :  { %v2902_v36 = vmul.f32 %v2894_v6, %v2894_v6 }
 0x4d7   :  { %vm2915_vm9 = vcmp.lt.f32.partialorder %v2903_v8, %v2908_v33  ;;  %3353 = vrsqrt.f32 %v2903_v8  ;;  %vm2923_vm11 = vcmp.eq.f32.partialorder %v2903_v8, inf  ;;  %v2926_v49 = vand.u32 2147483648, %v2903_v8 }
 0x4d8   :  { %v2904_v37 = vadd.f32 %v2902_v36, %v2900_v7  ;;  %v3063_v38 = vsel %vm2915_vm9, 1.0, %v3375_v1  ;;  %vm2925_vm12 = vcmp.eq.f32.partialorder %v2903_v8, 0.0 }
 0x4d9   :  { %v2937_v43 = vmul.f32 %v3063_v38, %v3458_v12 }
 0x4da   :  { %vm2916_vm10 = vcmp.lt.f32.partialorder %v2904_v37, %v2913_v40  ;;  %3355 = vrsqrt.f32 %v2904_v37  ;;  %vm2930_vm13 = vcmp.eq.f32.partialorder %v2904_v37, inf  ;;  %v2933_v55 = vand.u32 2147483648, %v2904_v37 }
 0x4db   :  { %2938 = vadd.xlane.f32.xlu0 %v2937_v43  ;;  %v3064_v41 = vsel %vm2916_vm10, 1.0, %v3375_v1  ;;  %vm2932_vm14 = vcmp.eq.f32.partialorder %v2904_v37, 0.0 }
 0x4dc   :  { %v2940_v45 = vmul.f32 %v3064_v41, %v3520_v44 }
 0x4de   :  { %2941 = vadd.xlane.f32.xlu1 %v2940_v45 }
 0x4e4   :  { %v3354_v46 = vpop.eup %3353 }
 0x4e5   :  { %v2922_v47 = vmul.f32 %v3354_v46, %v2903_v8 }
 0x4e7   :  { %v3356_v50 = vpop.eup %3355  ;;  %v2924_v51 = vsel %vm2923_vm11, %v2903_v8, %v2922_v47 }
 0x4e8   :  { %v2927_v52 = vsel %vm2925_vm12, %v2926_v49, %v2924_v51  ;;  %v2929_v53 = vmul.f32 %v3356_v50, %v2904_v37 }
 0x4e9   :  { %v2935_v54 = vmul.f32 %v3063_v38, %v2927_v52 }
 0x4ea   :  { %v2931_v57 = vsel %vm2930_vm13, %v2904_v37, %v2929_v53 }
 0x4eb   :  { %v2943_v59 = vmul.f32 %v2935_v54, %v3458_v12  ;;  %v2934_v1 = vsel %vm2932_vm14, %v2933_v55, %v2931_v57 }
 0x4ec   :  { %v2936_v60 = vmul.f32 %v3064_v41, %v2934_v1 }
 0x4ed   :  { %2944 = vadd.xlane.f32.xlu0 %v2943_v59 }
 0x4ee   :  { %v2946_v61 = vmul.f32 %v2936_v60, %v3520_v44 }
 0x4ef   :  { %2949 = vrot.lane.b32.xlu1 %v2796_v58, %s3382_s1 }
 0x4f1   :  { %2947 = vadd.xlane.f32.xlu0 %v2946_v61 }
 0x507   :  { %2951 = vrot.lane.b32.xlu0 %v2795_v5, %s3382_s1 }
 0x564   :  { %v2939_v62 = vpop.xlane.xlu0 %2938 }
 0x565   :  { %v2959_v63 = vmax.f32 %v2939_v62, 1.0  ;;  %vm2981_vm15 = vcmp.gt.f32.partialorder %v2939_v62, 0.5 }
 0x566   :  { %v2983_v0 = vsel %vm2981_vm15, 1, %v3379_v11 }
 0x567   :  { %v2942_v2 = vpop.xlane.xlu1 %2941  ;;  %2985 = vrot.lane.b32.xlu0 %v2983_v0, %s3383_s26  ;;  %3357 = vrcp.f32 %v2959_v63 }
 0x568   :  { %v2960_v12 = vmax.f32 %v2942_v2, 1.0  ;;  %vm2982_vm0 = vcmp.gt.f32.partialorder %v2942_v2, 0.5 }
 0x569   :  { %v2984_v5 = vsel %vm2982_vm0, 1, %v3379_v11 }
 0x56a   :  { %3359 = vrcp.f32 %v2960_v12 }
 0x56b   :  { %v2950_v18 = vpop.permute.xlu1 %2949 }
 0x56c   :  { %3361 = vrcp.f32 %v2950_v18 }
 0x574   :  { %v3358_v44 = vpop.eup %3357 }
 0x576   :  { %v2945_v10 = vpop.xlane.xlu0 %2944 }
 0x577   :  { %v2962_v15 = vmul.f32 %v3358_v44, %v2945_v10  ;;  %v3360_v58 = vpop.eup %3359 }
 0x579   :  { %2969 = vrot.lane.b32.xlu1 %v2962_v15, %s3384_s27  ;;  %v3362_v21 = vpop.eup %3361 }
 0x57a   :  { %v2948_v16 = vpop.xlane.xlu0 %2947  ;;  %v2956_v22 = vmul.f32 %v3362_v21, %v3699_v56 }
 0x57b   :  { %v2964_v39 = vmul.f32 %v3360_v58, %v2948_v16 }
 0x57c   :  { %v2965_v24 = vadd.f32 1.0, %v2956_v22 }
 0x57d   :  { %2971 = vrot.lane.b32.xlu1 %v2964_v39, %s3384_s27 }
 0x57e   :  { %v2952_v19 = vpop.permute.xlu0 %2951 }
 0x57f   :  { %3363 = vrcp.f32 %v2952_v19 }
 0x581   :  { %2987 = vrot.lane.b32.xlu1 %v2984_v5, %s3383_s26 }
 0x58c   :  { %v3364_v23 = vpop.eup %3363 }
 0x58d   :  { %v2958_v14 = vmul.f32 %v3364_v23, %v3656_v20 }
 0x58f   :  { %v2966_v28 = vadd.f32 1.0, %v2958_v14 }
 0x5d9   :  { %v2986_v9 = vpop.permute.xlu0 %2985 }
 0x5da   :  { %vm2989_vm1 = vcmp.ne.s32.totalorder %v2986_v9, 0 }
 0x5db   :  { %vm2991_vm3 = vmand %vm2979_vm2, %vm2989_vm1 }
 0x5eb   :  { %v2970_v25 = vpop.permute.xlu1 %2969 }
 0x5ec   :  { %v2975_v26 = vsub.f32 %v2965_v24, %v2970_v25 }
 0x5ee   :  { %v2977_v27 = vmax.f32 %v2975_v26, 0.0 }
 0x5ef   :  { %v2972_v29 = vpop.permute.xlu1 %2971 }
 0x5f0   :  { %v2976_v30 = vsub.f32 %v2966_v28, %v2972_v29  ;;  %2995 = vrot.lane.b32.xlu0 %v2977_v27, %s3385_s28 }
 0x5f2   :  { %v2978_v11 = vmax.f32 %v2976_v30, 0.0 }
 0x5f3   :  { %v2988_v3 = vpop.permute.xlu1 %2987 }
 0x5f4   :  { %2997 = vrot.lane.b32.xlu1 %v2978_v11, %s3385_s28  ;;  %vm2990_vm4 = vcmp.ne.s32.totalorder %v2988_v3, 0 }
 0x5f5   :  { %vm2992_vm6 = vmand %vm2980_vm5, %vm2990_vm4 }
 0x662   :  { %v2996_v31 = vpop.permute.xlu0 %2995 }
 0x663   :  { %v3001_v32 = vsel %vm2991_vm3, %v2996_v31, 0.0 }
 0x664   :  { %3005 = vrot.lane.b32.xlu0 %v3001_v32, %s3386_s29 }
 0x666   :  { %v2998_v42 = vpop.permute.xlu1 %2997 }
 0x667   :  { %v3002_v17 = vsel %vm2992_vm6, %v2998_v42, 0.0 }
 0x668   :  { %3007 = vrot.lane.b32.xlu1 %v3002_v17, %s3386_s29 }
 0x6d6   :  { %v3006_v48 = vpop.permute.xlu0 %3005 }
 0x6d7   :  { %v3012_v33 = vsel %vm3011_vm7, %v3006_v48, 0.0 }
 0x6da   :  { %v3008_v13 = vpop.permute.xlu1 %3007 }
 0x6db   :  { %v3013_v34 = vsel %vm3011_vm7, %v3008_v13, 0.0 }
 0x6dc   :  { %v3014_v35 = vadd.f32 %v3013_v34, %v3012_v33 }
 0x6de   :  { %3015 = vadd.xlane.f32.xlu0 %v3014_v35 }
 0x767   :  { %v3016_v56 = vpop.xlane.xlu0 %3015 }
 0x768   :  { %v3017_v4 = vrot.slane %v3016_v56, 4 }
 0x76a   :  { %v3018_v6 = vadd.f32 %v3017_v4, %v3016_v56 }
 0x76c   :  { %v3019_v8 = vrot.slane %v3018_v6, 2 }
 0x76e   :  { %v3020_v7 = vadd.f32 %v3019_v8, %v3018_v6 }
 0x770   :  { %v3021_v36 = vrot.slane %v3020_v7, 1 }
 0x772   :  { %v3022_v37 = vadd.f32 %v3021_v36, %v3020_v7 }
 0x774   :  { %3317 = vpush %v3022_v37 }
 0x7a5   :  { %s3318_s30 = spop %3317 }
 0x7a6   :  { %3029 = sst [smem:[#allocation2]] %s3318_s30 }
 0x7a7   :  { %3037 = dma.smem_to_hbm %s3387_s5, 16, %s3742_s4, [#allocation3]  }
 0x7a8   :  { %3373 = dma.done.wait [#allocation3], 16  }
 0x7a9   :  { %3374 = vsyncadd [#allocation3], 4294967280 }
 0x7aa   :  { %3041 = sfence }
 0x7ab   :  { %3042 = vsyncpa [#allocation3], 1 }

</bundles_post_ra>
